<compile_context>
chip_gen: v6e
topology: v6e:2x2x1
jax: 0.10.0
libtpu: 0.0.40
codegen_flags: <defaults>
</compile_context>

<pallas_src>
import jax
import jax.numpy as jnp
from jax.experimental import pallas as pl
from jax.experimental.pallas import tpu as pltpu

_LANES = 128


def matchability_kernel(x_ref, o_ref):
    # x_ref: (BN, C, TILE_S, 128)   o_ref: (BN, 1, TILE_S, 128)
    # Compute in f32 for exp accuracy; the upcast lives in vregs only, HBM traffic
    # stays in the input dtype.  (bf16 compute on v6e/v7x would only trim vreg use.)
    x = x_ref[...].astype(jnp.float32)
    c_total = x.shape[1]
    x1 = x[:, 1:2]                                # (BN, 1, TILE_S, 128) matchability logit
    denom = jnp.ones_like(x1)                     # exp(x1 - x1) == 1
    for c in range(c_total):                      # static unroll over channels (C small)
        if c == 1:
            continue
        # clamp keeps intermediates finite; saturated limit still -> 0 correctly
        denom = denom + jnp.exp(jnp.minimum(x[:, c:c + 1] - x1, 80.0))
    o_ref[...] = pl.reciprocal(denom, approx=True).astype(o_ref.dtype)


def matchability(x, *, tile_s=512):
    """x: (N, C, H, W), C >= 2. Returns softmax(x, axis=1)[:, 1:2] of shape (N, 1, H, W)."""
    N, C, H, W = x.shape
    if C < 2:
        raise ValueError("matchability expects at least 2 channels")
    HW = H * W
    S = -(-HW // _LANES)                          # rows of 128 lanes

    if S <= tile_s:
        tile_s = S                                # single spatial tile; full-extent block is legal
    else:
        tile_s = max(8, (tile_s // 8) * 8)        # sublane-aligned tile

    S_pad = -(-S // tile_s) * tile_s
    n_tiles = S_pad // tile_s
    pad = S_pad * _LANES - HW

    xf = x.reshape(N, C, HW)
    if pad:
        xf = jnp.pad(xf, ((0, 0), (0, 0), (0, pad)))
    xf = xf.reshape(N, C, S_pad, _LANES)

    # Fold the whole batch into a single grid step for tiny maps (saves N-1
    # pipeline prologues/epilogues of ~0.35us each).
    itemsize = jnp.dtype(x.dtype).itemsize
    block_bytes = (C + 1) * tile_s * _LANES * itemsize
    bn = N if (n_tiles == 1 and N * block_bytes * 2 <= (4 << 20)) else 1

    out = pl.pallas_call(
        matchability_kernel,
        out_shape=jax.ShapeDtypeStruct((N, 1, S_pad, _LANES), x.dtype),
        grid_spec=pl.GridSpec(
            grid=(N // bn, n_tiles),
            in_specs=[pl.BlockSpec((bn, C, tile_s, _LANES),
                                   lambda n, s: (n, 0, s, 0))],
            out_specs=pl.BlockSpec((bn, 1, tile_s, _LANES),
                                   lambda n, s: (n, 0, s, 0)),
        ),
        compiler_params=pltpu.CompilerParams(
            dimension_semantics=("parallel", "parallel")),
    )(xf)

    out = out.reshape(N, 1, S_pad * _LANES)
    if pad:
        out = out[:, :, :HW]
    return out.reshape(N, 1, H, W)


class ExportableMatchability:
    """JAX analogue of the PyTorch module (no parameters)."""

    def __call__(self, x):
        return matchability(x)


if __name__ == "__main__":
    mod = ExportableMatchability()

    # canonical matchability input: 2-channel NCHW score map
    x = jax.random.normal(jax.random.PRNGKey(0), (2, 2, 16, 16), dtype=jnp.float32)
    out = jax.block_until_ready(mod(x))
    ref = jax.nn.softmax(x, axis=1)[:, 1:2, :, :]
    assert out.shape == (2, 1, 16, 16)
    # tolerance accounts for the EUP approx reciprocal
    assert jnp.allclose(out, ref, atol=5e-3, rtol=5e-3)

    # generic-C / padded-spatial path (H*W not a multiple of 128)
    x2 = jax.random.normal(jax.random.PRNGKey(1), (2, 4, 24, 24), dtype=jnp.float32)
    out2 = jax.block_until_ready(mod(x2))
    ref2 = jax.nn.softmax(x2, axis=1)[:, 1:2, :, :]
    assert out2.shape == (2, 1, 24, 24)
    assert jnp.allclose(out2, ref2, atol=5e-3, rtol=5e-3)

    print("KERNEL_OK")
</pallas_src>

<mosaic_0001>
module attributes {stable_mosaic.version = 11 : i64} {
  func.func @matchability_kernel(%arg0: i32, %arg1: i32, %arg2: memref<2x2x2x128xf32, #tpu.memory_space<vmem>>, %arg3: memref<2x1x2x128xf32, #tpu.memory_space<vmem>>) attributes {dimension_semantics = [#tpu.dimension_semantics<parallel>, #tpu.dimension_semantics<parallel>], iteration_bounds = array<i64: 1, 1>, scalar_prefetch = 0 : i64, scratch_operands = 0 : i64, tpu.core_type = #tpu.core_type<tc>, window_params = [{transform_indices = @transform_0, window_bounds = array<i64: 2, 2, 2, 128>}, {transform_indices = @transform_1, window_bounds = array<i64: 2, 1, 2, 128>}]} {
    %c0 = arith.constant 0 : index
    %c0_0 = arith.constant 0 : index
    %c0_1 = arith.constant 0 : index
    %c0_2 = arith.constant 0 : index
    %0 = vector.load %arg2[%c0, %c0_0, %c0_1, %c0_2] : memref<2x2x2x128xf32, #tpu.memory_space<vmem>>, vector<2x2x2x128xf32>
    %1 = vector.extract_strided_slice %0 {offsets = [0, 1, 0, 0], sizes = [2, 1, 2, 128], strides = [1, 1, 1, 1]} : vector<2x2x2x128xf32> to vector<2x1x2x128xf32>
    %cst = arith.constant 1.000000e+00 : f32
    %2 = vector.broadcast %cst : f32 to vector<2x1x2x128xf32>
    %3 = vector.extract_strided_slice %0 {offsets = [0, 0, 0, 0], sizes = [2, 1, 2, 128], strides = [1, 1, 1, 1]} : vector<2x2x2x128xf32> to vector<2x1x2x128xf32>
    %4 = arith.subf %3, %1 : vector<2x1x2x128xf32>
    %cst_3 = arith.constant 8.000000e+01 : f32
    %5 = vector.broadcast %cst_3 : f32 to vector<2x1x2x128xf32>
    %6 = arith.minimumf %4, %5 : vector<2x1x2x128xf32>
    %7 = math.exp %6 : vector<2x1x2x128xf32>
    %8 = arith.addf %2, %7 : vector<2x1x2x128xf32>
    %9 = tpu.reciprocal %8 {approx = true} : vector<2x1x2x128xf32> -> vector<2x1x2x128xf32>
    %c0_4 = arith.constant 0 : index
    %c0_5 = arith.constant 0 : index
    %c0_6 = arith.constant 0 : index
    %c0_7 = arith.constant 0 : index
    %10 = vector.load %arg3[%c0_4, %c0_5, %c0_6, %c0_7] : memref<2x1x2x128xf32, #tpu.memory_space<vmem>>, vector<2x1x2x128xf32>
    tpu.vector_store %arg3[%c0_4, %c0_5, %c0_6, %c0_7], %9 {strides = array<i32>} : memref<2x1x2x128xf32, #tpu.memory_space<vmem>>, vector<2x1x2x128xf32>,
    return
  }
  func.func @transform_0(%arg0: i32, %arg1: i32) -> (i32, i32, i32, i32) {
    %c0_i32 = arith.constant 0 : i32
    %c0_i32_0 = arith.constant 0 : i32
    %c0_i32_1 = arith.constant 0 : i32
    return %arg0, %c0_i32, %arg1, %c0_i32_0 : i32, i32, i32, i32
  }
  func.func @transform_1(%arg0: i32, %arg1: i32) -> (i32, i32, i32, i32) {
    %c0_i32 = arith.constant 0 : i32
    %c0_i32_0 = arith.constant 0 : i32
    %c0_i32_1 = arith.constant 0 : i32
    return %arg0, %c0_i32, %arg1, %c0_i32_0 : i32, i32, i32, i32
  }
}

</mosaic_0001>

<bundles_post_ra>
// kernel: tpu_custom_call.1
= control target key start
LH: loop header
LB: loop body
LE: loop exit
PB: predicated region body
PF: predicated region fallthrough
CT: control target
= control target key end

     0   :  { %6 = vsyncpa [#allocation3], 0  ;;  %s140_s0 = inlined_call_operand.hbm [shape: f32[2,2,2,128], index: 0, kind: input, shape index: {}]   ;;  %s141_s1 = inlined_call_operand.hbm [shape: f32[2,1,2,128], index: 1, kind: output, shape index: {}]  }
   0x1   :  { %7 = vsyncpa [#allocation4], 0  ;;  %s114_s6 = smov [#allocation2]  }
   0x2   :  { %s13_s7 = sshll.u32 %s114_s6, 4  ;;  %s14_s7 = int_to_ptr.vmem [resolvable:$true] %s13_s7 }
   0x3   :  { %s78_s8 = scalar_lea.vmem %s14_s7, 128  ;;  %p83_p1 = scmp.lt.s32.totalorder %s14_s7, %s14_s7 }
   0x4   :  { %p79_p0 = scmp.ne.s32.totalorder %s14_s7, %s78_s8  ;;  %p84_p2 = scmp.lt.s32.totalorder %s78_s8, %s78_s8 }
   0x6   :  { %p85_p3 = por %p84_p2, %p83_p1 }
   0x8   :  { %p86_p4 = pnand %p85_p3, %p79_p0 }
   0xa   :  { %89 = shalt.err (!%p86_p4)
}
   0xb   :  { %s115_s9 = smov 32   ;;  %s116_s10 = smov 2  }
   0xc   :  { %19 = dma.hbm_to_vmem [thread:$0]  %s140_s0, 128, %s14_s7, [#allocation3], %s115_s9, %s115_s9, %s116_s10  }
   0xd   :  { %110 = dma.done.wait [#allocation3], 128  }
   0xe   :  { %111 = vsyncadd [#allocation3], 4294967168  ;;  %v23_v0 = vld [vmem:[#allocation2] sm:$0x3]  ;;  %v24_v1 = vld [vmem:[#allocation2 + $0x2] sm:$0x3] }
   0xf   :  { %v25_v2 = vld [vmem:[#allocation2 + $0x4] sm:$0x3]  ;;  %v27_v3 = vsub.f32 %v23_v0, %v24_v1  ;;  %v26_v4 = vld [vmem:[#allocation2 + $0x6] sm:$0x3]  ;;  %s117_s0 = smov [#allocation5]  }
  0x10   :  { %v28_v5 = vsub.f32 %v25_v2, %v26_v4  ;;  %s46_s13 = sshll.u32 %s117_s0, 4  ;;  %s47_s13 = int_to_ptr.vmem [resolvable:$true] %s46_s13 }
  0x11   :  { %v29_v6 = vmin.f32 %v27_v3, 80.0  ;;  %s90_s14 = scalar_lea.vmem %s47_s13, 64  ;;  %p95_p6 = scmp.lt.s32.totalorder %s47_s13, %s47_s13 }
  0x12   :  { %v30_v7 = vmin.f32 %v28_v5, 80.0  ;;  %p91_p5 = scmp.ne.s32.totalorder %s47_s13, %s90_s14  ;;  %p96_p7 = scmp.lt.s32.totalorder %s90_s14, %s90_s14 }
  0x13   :  { %v31_v8 = vmul.f32 1.442695, %v29_v6 }
  0x14   :  { %v33_v9 = vmul.f32 1.442695, %v30_v7  ;;  %p97_p8 = por %p96_p7, %p95_p6 }
  0x15   :  { %62 = vpow2.f32 %v31_v8 }
  0x16   :  { %64 = vpow2.f32 %v33_v9  ;;  %p98_p9 = pnand %p97_p8, %p91_p5 }
  0x22   :  { %v63_v10 = vpop.eup %62 }
  0x23   :  { %v65_v11 = vpop.eup %64  ;;  %v35_v12 = vadd.f32 1.0, %v63_v10 }
  0x24   :  { %v36_v13 = vadd.f32 1.0, %v65_v11 }
  0x25   :  { %66 = vrcp.f32 %v35_v12 }
  0x26   :  { %68 = vrcp.f32 %v36_v13 }
  0x32   :  { %v67_v14 = vpop.eup %66 }
  0x33   :  { %v69_v15 = vpop.eup %68  ;;  %39 = vst [vmem:[#allocation5] sm:$0x3] %v67_v14 }
  0x34   :  { %40 = vst [vmem:[#allocation5 + $0x2] sm:$0x3] %v69_v15 }
  0x35   :  { %101 = shalt.err (!%p98_p9)
}
  0x36   :  { %52 = dma.vmem_to_hbm [thread:$0]  %s47_s13, 64, %s141_s1, [#allocation4], %s115_s9, %s115_s9, %s116_s10  }
  0x37   :  { %112 = dma.done.wait [#allocation4], 64  }
  0x38   :  { %113 = vsyncadd [#allocation4], 4294967232 }
  0x39   :  { %56 = vsyncpa [#allocation3], 1 }
  0x3a   :  { %57 = vsyncpa [#allocation4], 1 }

</bundles_post_ra>
